<compile_context>
chip_gen: v7x
topology: tpu7x:2x2x1
jax: 0.10.0
libtpu: 0.0.40
codegen_flags: <defaults>
</compile_context>

<pallas_src>
import jax
import jax.numpy as jnp
from jax import lax
from jax.experimental import pallas as pl
from jax.experimental.pallas import tpu as pltpu

HIDDEN = 256                      # projector hidden width (fixed by the module)
BN_EPS = 1e-5
LANE = 128


def _round_up(x, m):
    return (x + m - 1) // m * m


def _vmem_budget():
    """Generation-aware (vmem_limit_bytes, streamed-tile budget, max batch tile)."""
    try:
        cap = int(pltpu.get_tpu_info().vmem_capacity_bytes)
    except Exception:
        cap = 64 * 1024 * 1024
    if cap >= 100 * 1024 * 1024:                       # v5e / v6e: 128 MiB VMEM / core
        return 64 * 1024 * 1024, 32 * 1024 * 1024, 2048
    return 32 * 1024 * 1024, 8 * 1024 * 1024, 512      # v7x: 64 MiB / core


def _fused_fits(batch, c_in, e_pad, budget):
    """Whole-batch single-tile footprint check (per branch, double-buffered)."""
    per_branch = (6 * batch * c_in                     # f32 x block + bf16 cast
                  + 16 * batch * HIDDEN                # h / activation intermediates
                  + 4 * batch * e_pad                  # f32 output block
                  + 2 * c_in * HIDDEN + 2 * HIDDEN * e_pad   # bf16 weights (resident)
                  + 64 * HIDDEN + 8 * e_pad)
    return 2 * per_branch <= budget


def _choose_batch_tile(c_in, e_pad, budget, tb_max):
    """Largest batch tile (multiple of 16 for bf16 sublane packing) whose
    double-buffered streamed footprint plus resident weights fits the budget."""
    resident = 2 * c_in * HIDDEN + 2 * HIDDEN * e_pad + 64 * HIDDEN + 8 * e_pad
    per_row = max(6 * c_in + 2 * HIDDEN,               # pass 1: f32 x (+bf16 cast) + bf16 h
                  10 * HIDDEN + 4 * e_pad)             # pass 2: bf16 h + f32 temps + f32 out
    tb = tb_max
    while tb > 16 and 2 * tb * per_row + resident > budget:
        tb //= 2
    return tb


# ---------------------------------------------------------------------------
# Projector kernels (TFC_Standard_Projector)
# ---------------------------------------------------------------------------
def _make_fused_branch_kernel(batch):
    """Whole-batch fused kernel, one grid step per branch (branch axis 'parallel')."""
    inv_b = 1.0 / float(batch)

    def kernel(x_ref, w1_ref, gamma_ref, beta_ref, w2_ref, b2_ref, o_ref):
        # Linear-1 bias intentionally omitted: BatchNorm's mean subtraction cancels
        # any per-feature constant.  Do NOT re-add it here.
        h = jnp.dot(x_ref[0].astype(jnp.bfloat16), w1_ref[0],
                    preferred_element_type=jnp.float32)
        mean = jnp.sum(h, axis=0, keepdims=True) * inv_b
        var = jnp.maximum(jnp.sum(h * h, axis=0, keepdims=True) * inv_b - mean * mean,
                          0.0)
        scale = gamma_ref[0] * lax.rsqrt(var + BN_EPS)      # BN folded to scale/shift
        shift = beta_ref[0] - mean * scale
        a = jnp.maximum(h * scale + shift, 0.0).astype(jnp.bfloat16)
        o_ref[0] = (jnp.dot(a, w2_ref[0], preferred_element_type=jnp.float32)
                    + b2_ref[0])

    return kernel


def _make_pass1_kernel(batch, tile_rows):
    """h = x @ W1 on the MXU (bf16 operands, f32 accumulation); stores h as bf16 and a
    per-tile partial [sum; sumsq] block (no resident accumulator -> 'parallel' axis)."""
    ragged = (batch % tile_rows) != 0

    def kernel(x_ref, w1_ref, h_ref, stats_ref):
        # Linear-1 bias intentionally omitted (cancelled by BN); keeps out-of-range
        # rows at exactly zero contribution once masked below.
        h = jnp.dot(x_ref[...].astype(jnp.bfloat16), w1_ref[...],
                    preferred_element_type=jnp.float32)
        h_ref[...] = h.astype(jnp.bfloat16)
        if ragged:
            row = (pl.program_id(0) * tile_rows
                   + lax.broadcasted_iota(jnp.int32, (tile_rows, 1), 0))
            h = jnp.where(row < batch, h, 0.0)          # mask garbage ragged rows
        stats_ref[0] = jnp.concatenate(
            [jnp.sum(h, axis=0, keepdims=True),
             jnp.sum(h * h, axis=0, keepdims=True)], axis=0)   # single store

    return kernel


def _pass2_kernel(h_ref, scale_ref, shift_ref, w2_ref, b2_ref, o_ref):
    """BN (pre-folded scale/shift) -> ReLU -> second bf16 MXU matmul, lane-dense out."""
    a = jnp.maximum(h_ref[...].astype(jnp.float32) * scale_ref[...] + shift_ref[...],
                    0.0).astype(jnp.bfloat16)
    o_ref[...] = (jnp.dot(a, w2_ref[...], preferred_element_type=jnp.float32)
                  + b2_ref[...])


def _fused_branches(xs, ps):
    """Run 1 or 2 projector branches (same shapes) in one pallas_call, grid=(nb,),
    branch axis 'parallel' (maps onto both TensorCores on v7x)."""
    nb = len(xs)
    B, C = xs[0].shape
    E = ps[0]["w2"].shape[1]
    E_pad = _round_up(E, LANE)
    vmem_limit, _, _ = _vmem_budget()

    def stack(name, pad_last=False):
        arrs = [p[name] for p in ps]
        if pad_last and E_pad != E:
            arrs = [jnp.pad(a, ((0, 0), (0, E_pad - E))) for a in arrs]
        return jnp.stack(arrs, axis=0)

    x = jnp.stack([a.astype(jnp.float32) for a in xs], axis=0)
    w1, gamma, beta = stack("w1"), stack("gamma"), stack("beta")
    w2, b2 = stack("w2", True), stack("b2", True)

    def spec(r, c):
        return pl.BlockSpec((1, r, c), lambda b: (b, 0, 0))

    out = pl.pallas_call(
        _make_fused_branch_kernel(B),
        out_shape=jax.ShapeDtypeStruct((nb, B, E_pad), jnp.float32),
        grid=(nb,),
        in_specs=[spec(B, C), spec(C, HIDDEN), spec(1, HIDDEN), spec(1, HIDDEN),
                  spec(HIDDEN, E_pad), spec(1, E_pad)],
        out_specs=spec(B, E_pad),
        compiler_params=pltpu.CompilerParams(
            dimension_semantics=("parallel",), vmem_limit_bytes=vmem_limit),
        cost_estimate=pl.CostEstimate(
            flops=nb * (2 * B * HIDDEN * (C + E_pad) + 8 * B * HIDDEN),
            transcendentals=nb * HIDDEN,
            bytes_accessed=nb * (4 * B * C + 2 * C * HIDDEN + 2 * HIDDEN * E_pad
                                 + 16 * HIDDEN + 8 * E_pad + 4 * B * E_pad)),
    )(x, w1, gamma, beta, w2, b2)
    return [out[i, :, :E] for i in range(nb)]


def _tiled_projector(x, params, tb, e_pad, vmem_limit):
    """Two-pass batch-tiled projector for large batches; both passes 'parallel'."""
    B, C = x.shape
    E = params["w2"].shape[1]
    w1 = params["w1"]
    gamma, beta = params["gamma"], params["beta"]
    w2, b2 = params["w2"], params["b2"]
    if e_pad != E:                                   # lane-dense (mult-of-128) output
        w2 = jnp.pad(w2, ((0, 0), (0, e_pad - E)))
        b2 = jnp.pad(b2, ((0, 0), (0, e_pad - E)))
    n_tiles = pl.cdiv(B, tb)

    # TODO(synk): sweep pipeline_mode=pl.Buffered(3) on the streamed specs if profiles
    #             show exposed DMA gaps.
    h, part = pl.pallas_call(
        _make_pass1_kernel(B, tb),
        out_shape=(jax.ShapeDtypeStruct((B, HIDDEN), jnp.bfloat16),
                   jax.ShapeDtypeStruct((n_tiles, 2, HIDDEN), jnp.float32)),
        grid=(n_tiles,),
        in_specs=[pl.BlockSpec((tb, C), lambda i: (i, 0)),          # streamed f32 x
                  pl.BlockSpec((C, HIDDEN), lambda i: (0, 0))],     # resident weights
        out_specs=(pl.BlockSpec((tb, HIDDEN), lambda i: (i, 0)),    # streamed bf16 h
                   pl.BlockSpec((1, 2, HIDDEN), lambda i: (i, 0, 0))),  # per-tile stats
        compiler_params=pltpu.CompilerParams(
            dimension_semantics=("parallel",),       # no resident accumulator any more
            vmem_limit_bytes=vmem_limit),
        cost_estimate=pl.CostEstimate(
            flops=2 * B * C * HIDDEN + 4 * B * HIDDEN,
            transcendentals=0,
            bytes_accessed=(4 * B * C + 2 * C * HIDDEN + 2 * B * HIDDEN
                            + 8 * n_tiles * HIDDEN)),
    )(x.astype(jnp.float32), w1)

    # Tiny partial reduction + BN fold (scale/shift) done once in XLA between passes.
    s = jnp.sum(part, axis=0)                               # (2, HIDDEN)
    mean = s[0:1] / B
    var = jnp.maximum(s[1:2] / B - mean * mean, 0.0)
    scale = gamma * lax.rsqrt(var + BN_EPS)
    shift = beta - mean * scale

    out = pl.pallas_call(
        _pass2_kernel,
        out_shape=jax.ShapeDtypeStruct((B, e_pad), jnp.float32),
        grid=(n_tiles,),
        in_specs=[pl.BlockSpec((tb, HIDDEN), lambda i: (i, 0)),     # streamed bf16 h
                  pl.BlockSpec((1, HIDDEN), lambda i: (0, 0)),      # folded BN scale
                  pl.BlockSpec((1, HIDDEN), lambda i: (0, 0)),      # folded BN shift
                  pl.BlockSpec((HIDDEN, e_pad), lambda i: (0, 0)),  # resident weights
                  pl.BlockSpec((1, e_pad), lambda i: (0, 0))],
        out_specs=pl.BlockSpec((tb, e_pad), lambda i: (i, 0)),
        compiler_params=pltpu.CompilerParams(
            dimension_semantics=("parallel",),       # megacore-shardable
            vmem_limit_bytes=vmem_limit),
        cost_estimate=pl.CostEstimate(
            flops=2 * B * HIDDEN * e_pad + 4 * B * HIDDEN,
            transcendentals=0,
            bytes_accessed=(2 * B * HIDDEN + 8 * HIDDEN + 2 * HIDDEN * e_pad
                            + 4 * e_pad + 4 * B * e_pad)),
    )(h, scale, shift, w2, b2)

    return out[:, :E]


def tfc_projector_forward(x, params, tile_rows=None):
    """TFC_Standard_Projector: Linear(C,256) -> BatchNorm1d (training batch stats) ->
    ReLU -> Linear(256,E).  x: (B, C) float.  Returns (B, E) float32."""
    B, C = x.shape
    E = params["w2"].shape[1]
    E_pad = _round_up(E, LANE)
    vmem_limit, tile_budget, tb_max = _vmem_budget()
    if tile_rows is None and _fused_fits(B, C, E_pad, tile_budget):
        return _fused_branches([x], [params])[0]
    tb = tile_rows if tile_rows is not None else _choose_batch_tile(C, E_pad,
                                                                    tile_budget, tb_max)
    return _tiled_projector(x, params, tb, E_pad, vmem_limit)


def tfc_dual_projector_forward(x_t, x_f, params_t, params_f):
    """Time + frequency projectors fused into ONE pallas_call with a size-2 'parallel'
    branch grid axis (halves launch overhead; maps onto both TensorCores on v7x).
    Falls back to per-branch calls when shapes differ or the batch is too large."""
    B, C = x_t.shape
    E_pad = _round_up(params_t["w2"].shape[1], LANE)
    _, tile_budget, _ = _vmem_budget()
    same = (x_f.shape == x_t.shape
            and params_f["w1"].shape == params_t["w1"].shape
            and params_f["w2"].shape == params_t["w2"].shape)
    if same and _fused_fits(B, C, E_pad, tile_budget):
        z_t, z_f = _fused_branches([x_t, x_f], [params_t, params_f])
        return z_t, z_f
    return tfc_projector_forward(x_t, params_t), tfc_projector_forward(x_f, params_f)


# ---------------------------------------------------------------------------
# TFC_Conv_Block encoders + default TFC_Transforms (XLA, MXU-friendly im2col layout)
# ---------------------------------------------------------------------------
def _conv_block_forward(x, block_params):
    """TFC_Conv_Block forward. x: (B, C, L) f32 -> (B, 60, L_out) f32.
    The k=8 Conv1d stages are evaluated as channels-last im2col matmuls so XLA can put
    them on the MXU (the NCH tiny-channel conv layout under-utilizes the 128 lanes).
    BatchNorm uses training-mode batch statistics (biased variance, eps=1e-5)."""
    # TODO(synk): BatchNorm running_mean/running_var buffers are not updated.
    y = jnp.transpose(x, (0, 2, 1))                    # (B, L, C) channels-last
    for stage in block_params:
        w = stage["w"]                                 # (Co, Ci, 8)
        co, ci, k = w.shape
        ypad = jnp.pad(y, ((0, 0), (4, 4), (0, 0)))    # Conv1d padding=4, zeros
        l_out = ypad.shape[1] - k + 1
        patches = jnp.stack([ypad[:, j:j + l_out, :] for j in range(k)], axis=-1)
        # patches: (B, L_out, Ci, 8) -> flatten matches w.reshape(Co, Ci*8) ordering.
        y = jnp.einsum("blf,of->blo",
                       patches.reshape(patches.shape[0], l_out, ci * k),
                       w.reshape(co, ci * k),
                       preferred_element_type=jnp.float32)
        mean = jnp.mean(y, axis=(0, 1), keepdims=True)
        var = jnp.mean((y - mean) ** 2, axis=(0, 1), keepdims=True)
        y = ((y - mean) * lax.rsqrt(var + BN_EPS) * stage["gamma"][None, None, :]
             + stage["beta"][None, None, :])
        y = jnp.maximum(y, 0.0)
        # MaxPool1d(kernel=2, stride=2, padding=1) -- implicit -inf padding.
        y = lax.reduce_window(y, -jnp.inf, lax.max,
                              window_dimensions=(1, 2, 1), window_strides=(1, 2, 1),
                              padding=[(0, 0), (1, 1), (0, 0)])
        # TODO(synk): nn.Dropout(0.35) (training-mode RNG) is treated as identity.
    return jnp.transpose(y, (0, 2, 1))                 # back to (B, C, L) for flatten


def tfc_backbone_forward(x, params):
    """TFC_Backbone forward. x: (B, C, L) f32.
    Returns (concat(z_time, z_freq), (h_time, z_time, h_freq, z_freq))."""
    # Default TFC_Transforms: time branch = raw signal, frequency branch = |FFT(x)|.
    # TODO(synk): the random jitter / frequency augmentations produced by
    #             TFC_Transforms are discarded by the backbone forward
    #             (x_in_t, _, x_in_f, _), so they are not generated here.
    x_t = x.astype(jnp.float32)
    x_f = jnp.abs(jnp.fft.fft(x_t, axis=-1)).astype(jnp.float32)

    ft = _conv_block_forward(x_t, params["time_encoder"])
    h_time = ft.reshape(ft.shape[0], -1)
    ff = _conv_block_forward(x_f, params["freq_encoder"])
    h_freq = ff.reshape(ff.shape[0], -1)

    z_time, z_freq = tfc_dual_projector_forward(
        h_time, h_freq, params["time_projector"], params["freq_projector"])
    return jnp.concatenate([z_time, z_freq], axis=1), (h_time, z_time, h_freq, z_freq)


# ---------------------------------------------------------------------------
# Parameter init (mimics PyTorch defaults) and pure-JAX reference
# ---------------------------------------------------------------------------
def init_conv_block_params(key, input_channels):
    chans = [(input_channels, 32), (32, 64), (64, 60)]
    params = []
    for k, (ci, co) in zip(jax.random.split(key, len(chans)), chans):
        bound = 1.0 / (ci * 8) ** 0.5
        params.append(dict(
            w=jax.random.uniform(k, (co, ci, 8), jnp.float32, -bound, bound),
            gamma=jnp.ones((co,), jnp.float32),
            beta=jnp.zeros((co,), jnp.float32)))
    return params


def init_projector_params(key, input_features, single_encoding_size):
    """Linear weights stored pre-transposed (in, out) and in bf16 for the MXU;
    BN affine params and biases stay f32."""
    k1, k2, k3, k4 = jax.random.split(key, 4)
    lim1 = 1.0 / input_features ** 0.5
    lim2 = 1.0 / HIDDEN ** 0.5
    return dict(
        w1=jax.random.uniform(k1, (input_features, HIDDEN), jnp.float32,
                              -lim1, lim1).astype(jnp.bfloat16),
        # Linear-1 bias: kept for the reference, but exactly cancelled by the BN mean
        # subtraction, so the Pallas kernels never load it.
        b1=jax.random.uniform(k2, (1, HIDDEN), jnp.float32, -lim1, lim1),
        gamma=jnp.ones((1, HIDDEN), jnp.float32),
        beta=jnp.zeros((1, HIDDEN), jnp.float32),
        w2=jax.random.uniform(k3, (HIDDEN, single_encoding_size), jnp.float32,
                              -lim2, lim2).astype(jnp.bfloat16),
        b2=jax.random.uniform(k4, (1, single_encoding_size), jnp.float32, -lim2, lim2))


def init_backbone_params(key, input_channels, ts_length, single_encoding_size):
    kt, kf, kpt, kpf = jax.random.split(key, 4)
    time_enc = init_conv_block_params(kt, input_channels)
    freq_enc = init_conv_block_params(kf, input_channels)
    # Mirror TFC_Backbone._calculate_fc_input_features with a shape-only pass.
    feat = jax.eval_shape(lambda z: _conv_block_forward(z, time_enc),
                          jax.ShapeDtypeStruct((1, input_channels, ts_length),
                                               jnp.float32))
    fc_in = int(feat.shape[1]) * int(feat.shape[2])
    return dict(time_encoder=time_enc, freq_encoder=freq_enc,
                time_projector=init_projector_params(kpt, fc_in, single_encoding_size),
                freq_projector=init_projector_params(kpf, fc_in, single_encoding_size))


def _reference_projector(x, p):
    """Pure-JAX projector forward with the same bf16 quantization points as the kernel."""
    xq = x.astype(jnp.bfloat16).astype(jnp.float32)
    h = xq @ p["w1"].astype(jnp.float32) + p["b1"]
    mean = jnp.mean(h, axis=0, keepdims=True)
    var = jnp.mean((h - mean) ** 2, axis=0, keepdims=True)
    h = (h - mean) * lax.rsqrt(var + BN_EPS) * p["gamma"] + p["beta"]
    a = jnp.maximum(h, 0.0).astype(jnp.bfloat16).astype(jnp.float32)
    return a @ p["w2"].astype(jnp.float32) + p["b2"]


if __name__ == "__main__":
    key = jax.random.PRNGKey(0)
    kx, kp, ks1, ks2 = jax.random.split(key, 4)

    # Small but representative shapes: batch=8, channels=3, TS_length=64, E=128.
    B, C_IN, TS_LEN, ENC = 8, 3, 64, 128
    x = jax.random.normal(kx, (B, C_IN, TS_LEN), jnp.float32)
    params = init_backbone_params(kp, C_IN, TS_LEN, ENC)

    fwd = jax.jit(tfc_backbone_forward)
    out, (h_t, z_t, h_f, z_f) = fwd(x, params)
    out = jax.block_until_ready(out)

    assert out.shape == (B, 2 * ENC), out.shape
    ref_t = _reference_projector(h_t, params["time_projector"])
    ref_f = _reference_projector(h_f, params["freq_projector"])
    assert jnp.allclose(z_t, ref_t, atol=5e-3, rtol=5e-3), float(jnp.abs(z_t - ref_t).max())
    assert jnp.allclose(z_f, ref_f, atol=5e-3, rtol=5e-3), float(jnp.abs(z_f - ref_f).max())
    assert jnp.allclose(out, jnp.concatenate([ref_t, ref_f], axis=1),
                        atol=5e-3, rtol=5e-3)

    # Exercise the batch-tiled two-pass path: per-tile partial stats, ragged last tile
    # (B=40, tile=16), bf16 h round-trip, non-multiple-of-128 output width (E=72->128).
    hb = jax.random.normal(ks1, (40, 96), jnp.float32)
    pp = init_projector_params(ks2, 96, 72)
    zt = jax.block_until_ready(tfc_projector_forward(hb, pp, tile_rows=16))
    ref_tiled = _reference_projector(hb, pp)
    assert zt.shape == (40, 72), zt.shape
    assert jnp.allclose(zt, ref_tiled, atol=1e-2, rtol=1e-2), \
        float(jnp.abs(zt - ref_tiled).max())

    print("KERNEL_OK")
</pallas_src>

<mosaic_0001>
module attributes {stable_mosaic.version = 11 : i64} {
  func.func @kernel(%arg0: i32, %arg1: memref<1x8x600xf32, #tpu.memory_space<vmem>>, %arg2: memref<1x600x256xbf16, #tpu.memory_space<vmem>>, %arg3: memref<1x1x256xf32, #tpu.memory_space<vmem>>, %arg4: memref<1x1x256xf32, #tpu.memory_space<vmem>>, %arg5: memref<1x256x128xbf16, #tpu.memory_space<vmem>>, %arg6: memref<1x1x128xf32, #tpu.memory_space<vmem>>, %arg7: memref<1x8x128xf32, #tpu.memory_space<vmem>>) attributes {dimension_semantics = [#tpu.dimension_semantics<parallel>], iteration_bounds = array<i64: 2>, scalar_prefetch = 0 : i64, scratch_operands = 0 : i64, tpu.core_type = #tpu.core_type<tc>, window_params = [{transform_indices = @transform_0, window_bounds = array<i64: 1, 8, 600>}, {transform_indices = @transform_1, window_bounds = array<i64: 1, 600, 256>}, {transform_indices = @transform_2, window_bounds = array<i64: 1, 1, 256>}, {transform_indices = @transform_3, window_bounds = array<i64: 1, 1, 256>}, {transform_indices = @transform_4, window_bounds = array<i64: 1, 256, 128>}, {transform_indices = @transform_5, window_bounds = array<i64: 1, 1, 128>}, {transform_indices = @transform_6, window_bounds = array<i64: 1, 8, 128>}]} {
    %c0 = arith.constant 0 : index
    %c0_0 = arith.constant 0 : index
    %c0_1 = arith.constant 0 : index
    %0 = vector.load %arg1[%c0, %c0_0, %c0_1] : memref<1x8x600xf32, #tpu.memory_space<vmem>>, vector<1x8x600xf32>
    %1 = vector.shape_cast %0 : vector<1x8x600xf32> to vector<8x600xf32>
    %2 = arith.truncf %1 : vector<8x600xf32> to vector<8x600xbf16>
    %c0_2 = arith.constant 0 : index
    %c0_3 = arith.constant 0 : index
    %c0_4 = arith.constant 0 : index
    %3 = vector.load %arg2[%c0_2, %c0_3, %c0_4] : memref<1x600x256xbf16, #tpu.memory_space<vmem>>, vector<1x600x256xbf16>
    %4 = vector.shape_cast %3 : vector<1x600x256xbf16> to vector<600x256xbf16>
    %cst = arith.constant dense<0.000000e+00> : vector<8x256xf32>
    %5 = tpu.matmul %2, %4, %cst {dimension_numbers = #tpu.dot_dimension_numbers<[1], [0], [0], [1], [0, 0, 1, 1], [], []>} : vector<8x600xbf16>, vector<600x256xbf16>, vector<8x256xf32> -> vector<8x256xf32>
    %cst_5 = arith.constant dense<0.000000e+00> : vector<256xf32>
    %6 = vector.multi_reduction <add>, %5, %cst_5 [0] : vector<8x256xf32> to vector<256xf32>
    %7 = vector.shape_cast %6 : vector<256xf32> to vector<1x256xf32>
    %cst_6 = arith.constant 1.250000e-01 : f32
    %8 = vector.broadcast %cst_6 : f32 to vector<1x256xf32>
    %9 = arith.mulf %7, %8 : vector<1x256xf32>
    %10 = arith.mulf %5, %5 : vector<8x256xf32>
    %cst_7 = arith.constant dense<0.000000e+00> : vector<256xf32>
    %11 = vector.multi_reduction <add>, %10, %cst_7 [0] : vector<8x256xf32> to vector<256xf32>
    %12 = vector.shape_cast %11 : vector<256xf32> to vector<1x256xf32>
    %cst_8 = arith.constant 1.250000e-01 : f32
    %13 = vector.broadcast %cst_8 : f32 to vector<1x256xf32>
    %14 = arith.mulf %12, %13 : vector<1x256xf32>
    %15 = arith.mulf %9, %9 : vector<1x256xf32>
    %16 = arith.subf %14, %15 : vector<1x256xf32>
    %cst_9 = arith.constant 0.000000e+00 : f32
    %17 = vector.broadcast %cst_9 : f32 to vector<1x256xf32>
    %18 = arith.maximumf %16, %17 : vector<1x256xf32>
    %c0_10 = arith.constant 0 : index
    %c0_11 = arith.constant 0 : index
    %c0_12 = arith.constant 0 : index
    %19 = vector.load %arg3[%c0_10, %c0_11, %c0_12] : memref<1x1x256xf32, #tpu.memory_space<vmem>>, vector<1x1x256xf32>
    %20 = vector.shape_cast %19 : vector<1x1x256xf32> to vector<1x256xf32>
    %cst_13 = arith.constant 9.99999974E-6 : f32
    %21 = vector.broadcast %cst_13 : f32 to vector<1x256xf32>
    %22 = arith.addf %18, %21 : vector<1x256xf32>
    %23 = math.rsqrt %22 : vector<1x256xf32>
    %24 = arith.mulf %20, %23 : vector<1x256xf32>
    %c0_14 = arith.constant 0 : index
    %c0_15 = arith.constant 0 : index
    %c0_16 = arith.constant 0 : index
    %25 = vector.load %arg4[%c0_14, %c0_15, %c0_16] : memref<1x1x256xf32, #tpu.memory_space<vmem>>, vector<1x1x256xf32>
    %26 = vector.shape_cast %25 : vector<1x1x256xf32> to vector<1x256xf32>
    %27 = arith.mulf %9, %24 : vector<1x256xf32>
    %28 = arith.subf %26, %27 : vector<1x256xf32>
    %29 = vector.broadcast %24 : vector<1x256xf32> to vector<8x256xf32>
    %30 = arith.mulf %5, %29 : vector<8x256xf32>
    %31 = vector.broadcast %28 : vector<1x256xf32> to vector<8x256xf32>
    %32 = arith.addf %30, %31 : vector<8x256xf32>
    %cst_17 = arith.constant 0.000000e+00 : f32
    %33 = vector.broadcast %cst_17 : f32 to vector<8x256xf32>
    %34 = arith.maximumf %32, %33 : vector<8x256xf32>
    %35 = arith.truncf %34 : vector<8x256xf32> to vector<8x256xbf16>
    %c0_18 = arith.constant 0 : index
    %c0_19 = arith.constant 0 : index
    %c0_20 = arith.constant 0 : index
    %36 = vector.load %arg5[%c0_18, %c0_19, %c0_20] : memref<1x256x128xbf16, #tpu.memory_space<vmem>>, vector<1x256x128xbf16>
    %37 = vector.shape_cast %36 : vector<1x256x128xbf16> to vector<256x128xbf16>
    %cst_21 = arith.constant dense<0.000000e+00> : vector<8x128xf32>
    %38 = tpu.matmul %35, %37, %cst_21 {dimension_numbers = #tpu.dot_dimension_numbers<[1], [0], [0], [1], [0, 0, 1, 1], [], []>} : vector<8x256xbf16>, vector<256x128xbf16>, vector<8x128xf32> -> vector<8x128xf32>
    %c0_22 = arith.constant 0 : index
    %c0_23 = arith.constant 0 : index
    %c0_24 = arith.constant 0 : index
    %39 = vector.load %arg6[%c0_22, %c0_23, %c0_24] : memref<1x1x128xf32, #tpu.memory_space<vmem>>, vector<1x1x128xf32>
    %40 = vector.shape_cast %39 : vector<1x1x128xf32> to vector<1x128xf32>
    %41 = vector.broadcast %40 : vector<1x128xf32> to vector<8x128xf32>
    %42 = arith.addf %38, %41 : vector<8x128xf32>
    %c0_25 = arith.constant 0 : index
    %c0_26 = arith.constant 0 : index
    %c0_27 = arith.constant 0 : index
    %43 = vector.load %arg7[%c0_25, %c0_26, %c0_27] : memref<1x8x128xf32, #tpu.memory_space<vmem>>, vector<1x8x128xf32>
    %44 = vector.shape_cast %43 : vector<1x8x128xf32> to vector<8x128xf32>
    %45 = vector.shape_cast %42 : vector<8x128xf32> to vector<1x8x128xf32>
    tpu.vector_store %arg7[%c0_25, %c0_26, %c0_27], %45 {strides = array<i32>} : memref<1x8x128xf32, #tpu.memory_space<vmem>>, vector<1x8x128xf32>,
    return
  }
  func.func @transform_0(%arg0: i32) -> (i32, i32, i32) {
    %c0_i32 = arith.constant 0 : i32
    %c0_i32_0 = arith.constant 0 : i32
    %c0_i32_1 = arith.constant 0 : i32
    return %arg0, %c0_i32, %c0_i32_0 : i32, i32, i32
  }
  func.func @transform_1(%arg0: i32) -> (i32, i32, i32) {
    %c0_i32 = arith.constant 0 : i32
    %c0_i32_0 = arith.constant 0 : i32
    %c0_i32_1 = arith.constant 0 : i32
    return %arg0, %c0_i32, %c0_i32_0 : i32, i32, i32
  }
  func.func @transform_2(%arg0: i32) -> (i32, i32, i32) {
    %c0_i32 = arith.constant 0 : i32
    %c0_i32_0 = arith.constant 0 : i32
    %c0_i32_1 = arith.constant 0 : i32
    return %arg0, %c0_i32, %c0_i32_0 : i32, i32, i32
  }
  func.func @transform_3(%arg0: i32) -> (i32, i32, i32) {
    %c0_i32 = arith.constant 0 : i32
    %c0_i32_0 = arith.constant 0 : i32
    %c0_i32_1 = arith.constant 0 : i32
    return %arg0, %c0_i32, %c0_i32_0 : i32, i32, i32
  }
  func.func @transform_4(%arg0: i32) -> (i32, i32, i32) {
    %c0_i32 = arith.constant 0 : i32
    %c0_i32_0 = arith.constant 0 : i32
    %c0_i32_1 = arith.constant 0 : i32
    return %arg0, %c0_i32, %c0_i32_0 : i32, i32, i32
  }
  func.func @transform_5(%arg0: i32) -> (i32, i32, i32) {
    %c0_i32 = arith.constant 0 : i32
    %c0_i32_0 = arith.constant 0 : i32
    %c0_i32_1 = arith.constant 0 : i32
    return %arg0, %c0_i32, %c0_i32_0 : i32, i32, i32
  }
  func.func @transform_6(%arg0: i32) -> (i32, i32, i32) {
    %c0_i32 = arith.constant 0 : i32
    %c0_i32_0 = arith.constant 0 : i32
    %c0_i32_1 = arith.constant 0 : i32
    return %arg0, %c0_i32, %c0_i32_0 : i32, i32, i32
  }
}

</mosaic_0001>

<bundles_post_ra>
// kernel: tfc_backbone_forward.1
= control target key start
LH: loop header
LB: loop body
LE: loop exit
PB: predicated region body
PF: predicated region fallthrough
CT: control target
= control target key end

     0   :  { %s1659_s21 = smov 0   ;;  %s1797_s0 = inlined_call_operand.vmem [shape: f32[2,8,600], index: 0, kind: input, shape index: {}]   ;;  %s1798_s1 = inlined_call_operand.vmem [shape: bf16[2,600,256], index: 1, kind: input, shape index: {}]   ;;  %s1799_s2 = inlined_call_operand.vmem [shape: f32[2,1,256], index: 2, kind: input, shape index: {}]   ;;  %s1800_s3 = inlined_call_operand.vmem [shape: f32[2,1,256], index: 3, kind: input, shape index: {}]   ;;  %s1801_s4 = inlined_call_operand.vmem [shape: bf16[2,256,128], index: 4, kind: input, shape index: {}]   ;;  %s1802_s5 = inlined_call_operand.vmem [shape: f32[2,1,128], index: 5, kind: input, shape index: {}]   ;;  %s1803_s6 = inlined_call_operand.vmem [shape: f32[2,8,128], index: 6, kind: output, shape index: {}]  }
   0x1 LB: > { %s1331_s22 = sadd.s32 4294967295, %s1620_s21   ;;  %p1335_p0 = scmp.ge.s32.totalorder %s1620_s21, 1  ;;  %s1620_s21 = sphi %s1659_s21, %s16_s21  }
   0x2   : > { %p258_p1 = scmp.lt.s32.totalorder %s1620_s21, 3 }
   0x4   : > { %p259_p2 = pnand %p1335_p0, %p258_p1 }
   0x5   : > { %p308_p3 = scmp.lt.s32.totalorder (!%p259_p2), %s1331_s22, 1  ;;  %vm803_vm0 = vcmask (!%p259_p2), 1043456   ;;  %vm799_vm1 = vcmask (!%p259_p2), 719872  }
   0x6   : > { %262 = sbr.rel (%p259_p2) target bundleno = 601 (0x259), region = 44 }
   0xd   : > { %s1805_s22 = smov (!%p308_p3, %s1331_s22), 1 }
   0xe   : > { %s1470_s23 = smul.u32 600, %s1805_s22  ;;  %s1440_s7 = sshll.u32 %s1805_s22, 7 }
   0xf   : > { %s1469_s27 = smul.u32 40, %s1805_s22  ;;  %s330_s10 = scalar_lea.vmem %s1801_s4, %s1440_s7 }
  0x10   : > { %s1673_s26 = scalar_lea.vmem %s1798_s1, %s1470_s23  ;;  %s1338_s11 = sshll.u32 %s1805_s22, 1 }
  0x11   : > { %v1481_v0 = vld [vmem:[%s1673_s26 + $0x104] ss:$8 sps:$4 sm:$0xff]   ;;  %v1483_v1 = vld [vmem:[%s1673_s26 + $0x100] ss:$8 sps:$4 sm:$0xff]   ;;  %v1484_v2 = vld [vmem:[%s1673_s26 + $0x114] ss:$8 sps:$4 sm:$0xff]   ;;  %s1713_s30 = scalar_lea.vmem %s1797_s0, %s1469_s27  ;;  %s321_s14 = scalar_lea.vmem %s1799_s2, %s1338_s11 }
  0x12   : > { %851 = vmatprep.subr.bf16.mxu0 %v1481_v0  ;;  %v1486_v3 = vld [vmem:[%s1673_s26 + $0x110] ss:$8 sps:$4 sm:$0xff]   ;;  %v1487_v4 = vld [vmem:[%s1673_s26 + $0x124] ss:$8 sps:$4 sm:$0xff]   ;;  %v1489_v5 = vld [vmem:[%s1673_s26 + $0x120] ss:$8 sps:$4 sm:$0xff]   ;;  %s325_s17 = scalar_lea.vmem %s1800_s3, %s1338_s11  ;;  %s333_s20 = scalar_lea.vmem %s1802_s5, %s1805_s22 }
  0x13   : > { %852 = vmatpush1.bf16.msra.mxu0 %v1483_v1  ;;  %v1490_v6 = vld [vmem:[%s1673_s26 + $0x134] ss:$8 sps:$4 sm:$0xff]   ;;  %v1498_v7 = vld [vmem:[%s1673_s26 + $0x4] ss:$8 sps:$4 sm:$0xff]   ;;  %v1501_v8 = vld [vmem:[%s1673_s26] ss:$8 sps:$4 sm:$0xff]  }
  0x14   : > { %853 = vmatprep.subr.bf16.mxu0 %v1484_v2  ;;  %810 = vmatprep.subr.bf16.mxu1 %v1498_v7  ;;  %v1492_v9 = vld [vmem:[%s1673_s26 + $0x130] ss:$8 sps:$4 sm:$0xff]   ;;  %v1504_v10 = vld [vmem:[%s1673_s26 + $0x14] ss:$8 sps:$4 sm:$0xff]   ;;  %v1493_v12 = vld [vmem:[%s1673_s26 + $0x144] ss:$8 sps:$4 sm:$0xff]  }
  0x15   : > { %811 = vmatpush1.bf16.msra.mxu1 %v1501_v8  ;;  %v1507_v11 = vld [vmem:[%s1673_s26 + $0x10] ss:$8 sps:$4 sm:$0xff]   ;;  %v1510_v13 = vld [vmem:[%s1673_s26 + $0x24] ss:$8 sps:$4 sm:$0xff]   ;;  %v1495_v14 = vld [vmem:[%s1673_s26 + $0x140] ss:$8 sps:$4 sm:$0xff]  }
  0x16   : > { %812 = vmatprep.subr.bf16.mxu1 %v1504_v10  ;;  %v1513_v15 = vld [vmem:[%s1673_s26 + $0x20] ss:$8 sps:$4 sm:$0xff]   ;;  %v1496_v16 = vld [vmem:[%s1673_s26 + $0x154] ss:$8 sps:$4 sm:$0xff]   ;;  %v1500_v18 = vld [vmem:[%s1673_s26 + $0x150] ss:$8 sps:$4 sm:$0xff]  }
  0x17   : > { %854 = vmatpush1.bf16.msra.mxu0 %v1486_v3  ;;  %v1516_v17 = vld [vmem:[%s1673_s26 + $0x34] ss:$8 sps:$4 sm:$0xff]   ;;  %v1502_v19 = vld [vmem:[%s1673_s26 + $0x164] ss:$8 sps:$4 sm:$0xff]   ;;  %v1519_v20 = vld [vmem:[%s1673_s26 + $0x30] ss:$8 sps:$4 sm:$0xff]  }
  0x18   : > { %855 = vmatprep.subr.bf16.mxu0 %v1487_v4  ;;  %v1522_v21 = vld [vmem:[%s1673_s26 + $0x44] ss:$8 sps:$4 sm:$0xff]   ;;  %v1506_v22 = vld [vmem:[%s1673_s26 + $0x160] ss:$8 sps:$4 sm:$0xff]   ;;  %v1508_v24 = vld [vmem:[%s1673_s26 + $0x174] ss:$8 sps:$4 sm:$0xff]  }
  0x19   : > { %813 = vmatpush1.bf16.msra.mxu1 %v1507_v11  ;;  %v1525_v23 = vld [vmem:[%s1673_s26 + $0x40] ss:$8 sps:$4 sm:$0xff]   ;;  %v1528_v25 = vld [vmem:[%s1673_s26 + $0x54] ss:$8 sps:$4 sm:$0xff]   ;;  %v1512_v26 = vld [vmem:[%s1673_s26 + $0x170] ss:$8 sps:$4 sm:$0xff]  }
  0x1a   : > { %814 = vmatprep.subr.bf16.mxu1 %v1510_v13  ;;  %v1514_v27 = vld [vmem:[%s1673_s26 + $0x184] ss:$8 sps:$4 sm:$0xff]   ;;  %v1531_v28 = vld [vmem:[%s1673_s26 + $0x50] ss:$8 sps:$4 sm:$0xff]   ;;  %v1518_v30 = vld [vmem:[%s1673_s26 + $0x180] ss:$8 sps:$4 sm:$0xff]  }
  0x1b   : > { %856 = vmatpush1.bf16.msra.mxu0 %v1489_v5  ;;  %v1534_v29 = vld [vmem:[%s1673_s26 + $0x64] ss:$8 sps:$4 sm:$0xff]   ;;  %v1537_v31 = vld [vmem:[%s1673_s26 + $0x60] ss:$8 sps:$4 sm:$0xff]   ;;  %v1520_v32 = vld [vmem:[%s1673_s26 + $0x194] ss:$8 sps:$4 sm:$0xff]  }
  0x1c   : > { %857 = vmatprep.subr.bf16.mxu0 %v1490_v6  ;;  %v1540_v33 = vld [vmem:[%s1673_s26 + $0x74] ss:$8 sps:$4 sm:$0xff]   ;;  %v1524_v34 = vld [vmem:[%s1673_s26 + $0x190] ss:$8 sps:$4 sm:$0xff]   ;;  %v1526_v35 = vld [vmem:[%s1673_s26 + $0x1a4] ss:$8 sps:$4 sm:$0xff]  }
  0x1d   : > { %815 = vmatpush1.bf16.msra.mxu1 %v1513_v15  ;;  %v1543_v36 = vld [vmem:[%s1673_s26 + $0x70] ss:$8 sps:$4 sm:$0xff]   ;;  %v1546_v37 = vld [vmem:[%s1673_s26 + $0x84] ss:$8 sps:$4 sm:$0xff]   ;;  %v1530_v40 = vld [vmem:[%s1673_s26 + $0x1a0] ss:$8 sps:$4 sm:$0xff]  }
  0x1e   : > { %816 = vmatprep.subr.bf16.mxu1 %v1516_v17  ;;  %v342_v38 = vld [vmem:[%s1713_s30 + $0x18] sm:$0xff]  ;;  %v1549_v41 = vld [vmem:[%s1673_s26 + $0x80] ss:$8 sps:$4 sm:$0xff]   ;;  %v1538_v46 = vld [vmem:[%s1673_s26 + $0x1c4] ss:$8 sps:$4 sm:$0xff]   ;;  %s1342_s23 = sshll.u32 %s1805_s22, 3 }
  0x1f   : > { %858 = vmatpush1.bf16.msra.mxu0 %v1492_v9  ;;  %v347_v39 = vpack.c.bf16 %v342_v38, %v342_v38  ;;  %v1532_v42 = vld [vmem:[%s1673_s26 + $0x1b4] ss:$8 sps:$4 sm:$0xff]   ;;  %v1536_v44 = vld [vmem:[%s1673_s26 + $0x1b0] ss:$8 sps:$4 sm:$0xff]   ;;  %v1558_v47 = vld [vmem:[%s1673_s26 + $0xa4] ss:$8 sps:$4 sm:$0xff]  }
  0x20   : > { %859 = vmatprep.subr.bf16.mxu0 %v1493_v12  ;;  %v1552_v43 = vld [vmem:[%s1673_s26 + $0x94] ss:$8 sps:$4 sm:$0xff]   ;;  %v1555_v45 = vld [vmem:[%s1673_s26 + $0x90] ss:$8 sps:$4 sm:$0xff]   ;;  %v1542_v48 = vld [vmem:[%s1673_s26 + $0x1c0] ss:$8 sps:$4 sm:$0xff]  }
  0x21   : > { %817 = vmatpush1.bf16.msra.mxu1 %v1519_v20  ;;  %883 = vmatprep.mubr.bf16.mxu0 %v347_v39  ;;  %v1561_v49 = vld [vmem:[%s1673_s26 + $0xa0] ss:$8 sps:$4 sm:$0xff]   ;;  %v1544_v50 = vld [vmem:[%s1673_s26 + $0x1d4] ss:$8 sps:$4 sm:$0xff]   ;;  %v1548_v53 = vld [vmem:[%s1673_s26 + $0x1d0] ss:$8 sps:$4 sm:$0xff]  }
  0x22   : > { %818 = vmatprep.subr.bf16.mxu1 %v1522_v21  ;;  %v1565_v51 = vld [vmem:[%s1673_s26 + $0xb4] ss:$8 sps:$4 sm:$0xff]   ;;  %v340_v52 = vld [vmem:[%s1713_s30 + $0x8] sm:$0xff]  ;;  %v1567_v54 = vld [vmem:[%s1673_s26 + $0xb0] ss:$8 sps:$4 sm:$0xff]   ;;  %v1622_v12 = vmov 0  }
  0x23   : > { %860 = vmatpush1.bf16.msra.mxu0 %v1495_v14  ;;  %v345_v55 = vpack.c.bf16 %v340_v52, %v340_v52  ;;  %v1550_v56 = vld [vmem:[%s1673_s26 + $0x1e4] ss:$8 sps:$4 sm:$0xff]   ;;  %v1554_v58 = vld [vmem:[%s1673_s26 + $0x1e0] ss:$8 sps:$4 sm:$0xff]   ;;  %v1556_v60 = vld [vmem:[%s1673_s26 + $0x1f4] ss:$8 sps:$4 sm:$0xff]  }
  0x24   : > { %861 = vmatprep.subr.bf16.mxu0 %v1496_v16  ;;  %v1571_v57 = vld [vmem:[%s1673_s26 + $0xc4] ss:$8 sps:$4 sm:$0xff]   ;;  %v1573_v59 = vld [vmem:[%s1673_s26 + $0xc0] ss:$8 sps:$4 sm:$0xff]   ;;  %v1577_v61 = vld [vmem:[%s1673_s26 + $0xd4] ss:$8 sps:$4 sm:$0xff]  }
  0x25   : > { %819 = vmatpush1.bf16.msra.mxu1 %v1525_v23  ;;  %842 = vmatprep.mubr.bf16.mxu1 %v345_v55  ;;  %v1560_v62 = vld [vmem:[%s1673_s26 + $0x1f0] ss:$8 sps:$4 sm:$0xff]   ;;  %v1564_v1 = vld [vmem:[%s1673_s26 + $0x204] ss:$8 sps:$4 sm:$0xff]   ;;  %v1562_v4 = vld [vmem:[%s1673_s26 + $0x200] ss:$8 sps:$4 sm:$0xff]  }
  0x26   : > { %820 = vmatprep.subr.bf16.mxu1 %v1528_v25  ;;  %v341_v63 = vld [vmem:[%s1713_s30 + $0x10] sm:$0xff]  ;;  %v1583_v2 = vld [vmem:[%s1673_s26 + $0xe4] ss:$8 sps:$4 sm:$0xff]   ;;  %v1585_v5 = vld [vmem:[%s1673_s26 + $0xe0] ss:$8 sps:$4 sm:$0xff]  }
  0x27   : > { %862 = vmatpush1.bf16.msra.mxu0 %v1500_v18  ;;  %v1579_v0 = vld [vmem:[%s1673_s26 + $0xd0] ss:$8 sps:$4 sm:$0xff]   ;;  %v346_v3 = vpack.c.bf16 %v341_v63, %v341_v63  ;;  %v1570_v6 = vld [vmem:[%s1673_s26 + $0x214] ss:$8 sps:$4 sm:$0xff]   ;;  %v339_v10 = vld [vmem:[%s1713_s30] sm:$0xff] }
  0x28   : > { %863 = vmatprep.subr.bf16.mxu0 %v1502_v19  ;;  %v1589_v7 = vld [vmem:[%s1673_s26 + $0xf4] ss:$8 sps:$4 sm:$0xff]   ;;  %v1568_v8 = vld [vmem:[%s1673_s26 + $0x210] ss:$8 sps:$4 sm:$0xff]   ;;  %v1576_v11 = vld [vmem:[%s1673_s26 + $0x224] ss:$8 sps:$4 sm:$0xff]   ;;  %v344_v13 = vpack.c.bf16 %v339_v10, %v339_v10 }
  0x29   : > { %821 = vmatpush1.bf16.msra.mxu1 %v1531_v28  ;;  %v1591_v9 = vld [vmem:[%s1673_s26 + $0xf0] ss:$8 sps:$4 sm:$0xff]   ;;  %v1574_v14 = vld [vmem:[%s1673_s26 + $0x220] ss:$8 sps:$4 sm:$0xff]   ;;  %v1582_v15 = vld [vmem:[%s1673_s26 + $0x234] ss:$8 sps:$4 sm:$0xff]  }
  0x2a   : > { %822 = vmatprep.subr.bf16.mxu1 %v1534_v29  ;;  %v1580_v16 = vld [vmem:[%s1673_s26 + $0x230] ss:$8 sps:$4 sm:$0xff]   ;;  %v1588_v17 = vld [vmem:[%s1673_s26 + $0x244] ss:$8 sps:$4 sm:$0xff]   ;;  %v1586_v19 = vld [vmem:[%s1673_s26 + $0x240] ss:$8 sps:$4 sm:$0xff]  }
  0x2b   : > { %864 = vmatpush1.bf16.msra.mxu0 %v1506_v22  ;;  %v423_v18 = vld [vmem:[%s1673_s26 + $0x250] sm:$0xff]  ;;  %v343_v22 = vld [vmem:[%s1713_s30 + $0x20] sm:$0xff]  ;;  %v1597_v28 = vld [vmem:[%s330_s10 + $0x8] sm:$0xff]   ;;  %s337_s26 = scalar_lea.vmem %s1803_s6, %s1342_s23 }
  0x2c   : > { %865 = vmatprep.subr.bf16.mxu0 %v1508_v24  ;;  %v1418_v20 = vcombine.high %v423_v18, %v423_v18  ;;  %v1417_v21 = vcombine.low %v423_v18, %v423_v18  ;;  %v348_v24 = vpack.c.bf16 %v343_v22, %v343_v22  ;;  %v1594_v25 = vld [vmem:[%s330_s10 + $0x40] sm:$0xff]   ;;  %v1598_v29 = vld [vmem:[%s330_s10 + $0x50] sm:$0xff]   ;;  %v1608_v39 = vld [vmem:[%s330_s10 + $0x78] sm:$0xff]  }
  0x2d   : > { %823 = vmatpush1.bf16.msra.mxu1 %v1537_v31  ;;  %v1600_v31 = vld [vmem:[%s330_s10 + $0x58] sm:$0xff]   ;;  %v1607_v38 = vld [vmem:[%s330_s10 + $0x30] sm:$0xff]  }
  0x2e   : > { %824 = vmatprep.subr.bf16.mxu1 %v1540_v33  ;;  %v805_v23 = vsel %vm803_vm0, %v1417_v21, 0  ;;  %v1602_v33 = vld [vmem:[%s330_s10 + $0x60] sm:$0xff]  }
  0x2f   : > { %866 = vmatpush1.bf16.msra.mxu0 %v1512_v26  ;;  %v1595_v26 = vld [vmem:[%s330_s10] sm:$0xff]  }
  0x30   : > { %867 = vmatprep.subr.bf16.mxu0 %v1514_v27  ;;  %v1596_v27 = vld [vmem:[%s330_s10 + $0x48] sm:$0xff]  }
  0x31   : > { %825 = vmatpush1.bf16.msra.mxu1 %v1543_v36  ;;  %v1605_v36 = vld [vmem:[%s330_s10 + $0x28] sm:$0xff]  }
  0x32   : > { %826 = vmatprep.subr.bf16.mxu1 %v1546_v37  ;;  %v1606_v37 = vld [vmem:[%s330_s10 + $0x70] sm:$0xff]  }
  0x33   : > { %868 = vmatpush1.bf16.msra.mxu0 %v1518_v30  ;;  %v1599_v30 = vld [vmem:[%s330_s10 + $0x10] sm:$0xff]  }
  0x34   : > { %869 = vmatprep.subr.bf16.mxu0 %v1520_v32  ;;  %v1601_v32 = vld [vmem:[%s330_s10 + $0x18] sm:$0xff]  }
  0x35   : > { %827 = vmatpush1.bf16.msra.mxu1 %v1549_v41 }
  0x36   : > { %828 = vmatprep.subr.bf16.mxu1 %v1552_v43 }
  0x37   : > { %870 = vmatpush1.bf16.msra.mxu0 %v1524_v34  ;;  %v1603_v34 = vld [vmem:[%s330_s10 + $0x20] sm:$0xff]  }
  0x38   : > { %871 = vmatprep.subr.bf16.mxu0 %v1526_v35  ;;  %v1604_v35 = vld [vmem:[%s330_s10 + $0x68] sm:$0xff]  }
  0x39   : > { %829 = vmatpush1.bf16.msra.mxu1 %v1555_v45 }
  0x3a   : > { %830 = vmatprep.subr.bf16.mxu1 %v1558_v47 }
  0x3b   : > { %872 = vmatpush1.bf16.msra.mxu0 %v1530_v40  ;;  %v1609_v40 = vld [vmem:[%s330_s10 + $0x38] sm:$0xff]  }
  0x3c   : > { %873 = vmatprep.subr.bf16.mxu0 %v1532_v42 }
  0x3d   : > { %831 = vmatpush1.bf16.msra.mxu1 %v1561_v49 }
  0x3e   : > { %832 = vmatprep.subr.bf16.mxu1 %v1565_v51 }
  0x3f   : > { %874 = vmatpush1.bf16.msra.mxu0 %v1536_v44 }
  0x40   : > { %875 = vmatprep.subr.bf16.mxu0 %v1538_v46 }
  0x41   : > { %833 = vmatpush1.bf16.msra.mxu1 %v1567_v54 }
  0x42   : > { %834 = vmatprep.subr.bf16.mxu1 %v1571_v57 }
  0x43   : > { %876 = vmatpush1.bf16.msra.mxu0 %v1542_v48 }
  0x44   : > { %877 = vmatprep.subr.bf16.mxu0 %v1544_v50 }
  0x45   : > { %835 = vmatpush1.bf16.msra.mxu1 %v1573_v59 }
  0x46   : > { %836 = vmatprep.subr.bf16.mxu1 %v1577_v61 }
  0x47   : > { %878 = vmatpush1.bf16.msra.mxu0 %v1548_v53 }
  0x48   : > { %879 = vmatprep.subr.bf16.mxu0 %v1550_v56 }
  0x49   : > { %837 = vmatpush1.bf16.msra.mxu1 %v1579_v0 }
  0x4a   : > { %838 = vmatprep.subr.bf16.mxu1 %v1583_v2 }
  0x4b   : > { %880 = vmatpush1.bf16.msra.mxu0 %v1554_v58 }
  0x4c   : > { %881 = vmatprep.subr.bf16.mxu0 %v1556_v60 }
  0x4d   : > { %839 = vmatpush1.bf16.msra.mxu1 %v1585_v5 }
  0x4e   : > { %840 = vmatprep.subr.bf16.mxu1 %v1589_v7 }
  0x4f   : > { %882 = vmatpush1.bf16.msra.mxu0 %v1560_v62 }
  0x50   : > { %892 = vmatprep.subr.bf16.mxu0 %v1564_v1 }
  0x51   : > { %841 = vmatpush1.bf16.msra.mxu1 %v1591_v9 }
  0x52   : > { %884 = vmatmul.mubr.bf16.vlgmr.msra.gmra.mrb[0].mxu0 %v346_v3  ;;  %1441 = vmatprep.subr.bf16.mxu1 %v1594_v25  ;;  %v1623_v25 = vmov 1966171168  }
  0x53   : > { %893 = vmatpush1.bf16.msra.mxu0 %v1562_v4  ;;  %924 = vmatprep.mubr.bf16.mxu0 %v1622_v12 }
  0x54   : > { %894 = vmatprep.subr.bf16.mxu0 %v1570_v6  ;;  %843 = vmatmul.mubr.bf16.vlgmr.msra.gmra.mrb[0].mxu1 %v344_v13 }
  0x55   : > { %1442 = vmatpush3.bf16.msra.mxu1 %v1595_v26  ;;  %v978_v26 = vunpack.c.l.s4 %v1623_v25 }
  0x56   : > { %1443 = vmatprep.subr.bf16.mxu1 %v1596_v27  ;;  %v980_v27 = vlaneseq }
  0x57   : > { %895 = vmatpush1.bf16.msra.mxu0 %v1568_v8 }
  0x58   : > { %896 = vmatprep.subr.bf16.mxu0 %v1576_v11 }
  0x59   : > { %1444 = vmatpush3.bf16.msra.mxu1 %v1597_v28  ;;  %v979_v28 = vunpack.c.0.s8 %v978_v26 }
  0x5a   : > { %1445 = vmatprep.subr.bf16.mxu1 %v1598_v29  ;;  %v981_v29 = vshrl.u32 %v980_v27, 7 }
  0x5b   : > { %897 = vmatpush1.bf16.msra.mxu0 %v1574_v14 }
  0x5c   : > { %898 = vmatprep.subr.bf16.mxu0 %v1582_v15 }
  0x5d   : > { %1446 = vmatpush3.bf16.msra.mxu1 %v1599_v30 }
  0x5e   : > { %1447 = vmatprep.subr.bf16.mxu1 %v1600_v31  ;;  %v982_v31 = vsub.s32 %v979_v28, %v981_v29 }
  0x5f   : > { %899 = vmatpush1.bf16.msra.mxu0 %v1580_v16 }
  0x60   : > { %900 = vmatprep.subr.bf16.mxu0 %v1588_v17 }
  0x61   : > { %1448 = vmatpush3.bf16.msra.mxu1 %v1601_v32 }
  0x62   : > { %1449 = vmatprep.subr.bf16.mxu1 %v1602_v33 }
  0x63   : > { %901 = vmatpush1.bf16.msra.mxu0 %v1586_v19 }
  0x64   : > { %1419 = vmatprep.subr.msk.bf16.mxu0 %vm803_vm0, %v1418_v20 }
  0x65   : > { %1450 = vmatpush3.bf16.msra.mxu1 %v1603_v34 }
  0x66   : > { %1451 = vmatprep.subr.bf16.mxu1 %v1604_v35  ;;  %v969_v35 = vld [vmem:[%s321_s14] sm:$0x3] }
  0x67   : > { %903 = vmatpush1.bf16.msra.mxu0 %v805_v23 }
  0x69   : > { %1452 = vmatpush3.bf16.msra.mxu1 %v1605_v36 }
  0x6a   : > { %1420 = vmatmul.mubr.msk.bf16.vlgmr.msra.gmra.mrb[0].mxu0 %vm799_vm1, %v348_v24  ;;  %1453 = vmatprep.subr.bf16.mxu1 %v1606_v37  ;;  %v997_v37 = vsub.s32 0, %v981_v29 }
  0x6d   : > { %1454 = vmatpush3.bf16.msra.mxu1 %v1607_v38  ;;  %v1001_v38 = vsub.s32 1, %v981_v29 }
  0x6e   : > { %1455 = vmatprep.subr.bf16.mxu1 %v1608_v39 }
  0x71   : > { %1456 = vmatpush3.bf16.msra.mxu1 %v1609_v40 }
 0x127   : > { %v844_v41 = vpop.f32.mrb[0].mxu1 }
 0x128   : > { %v846_v42 = vpop.f32.mrb[1].mxu1 }
 0x129   : > { %v848_v43 = vpop.f32.mrb[2].mxu1 }
 0x12a   : > { %v849_v44 = vpop.f32.mrb[3].mxu1 }
 0x13d   : > { %v926_v45 = vpop.f32.mrb[0].mxu0 }
 0x13e   : > { %v1765_v46 = vadd.f32 %v926_v45, %v844_v41  ;;  %v928_v47 = vpop.f32.mrb[1].mxu0 }
 0x13f   : > { %v1767_v48 = vadd.f32 %v928_v47, %v846_v42  ;;  %v930_v49 = vpop.f32.mrb[2].mxu0 }
 0x140   : > { %v933_v50 = vrot.slane %v1765_v46, 4  ;;  %v947_v51 = vmul.f32 %v1765_v46, %v1765_v46  ;;  %v931_v52 = vpop.f32.mrb[3].mxu0 }
 0x141   : > { %v939_v53 = vrot.slane %v1767_v48, 4  ;;  %v948_v54 = vmul.f32 %v1767_v48, %v1767_v48 }
 0x142   : > { %v934_v55 = vadd.f32 %v1765_v46, %v933_v50  ;;  %v949_v56 = vrot.slane %v947_v51, 4  ;;  %v993_v50 = vld [vmem:[%s325_s17] sm:$0x3] }
 0x143   : > { %v940_v57 = vadd.f32 %v1767_v48, %v939_v53  ;;  %v955_v58 = vrot.slane %v948_v54, 4 }
 0x144   : > { %v935_v59 = vrot.slane %v934_v55, 2  ;;  %v950_v60 = vadd.f32 %v949_v56, %v947_v51 }
 0x145   : > { %v941_v61 = vrot.slane %v940_v57, 2  ;;  %v956_v62 = vadd.f32 %v955_v58, %v948_v54 }
 0x146   : > { %v936_v63 = vadd.f32 %v935_v59, %v934_v55  ;;  %v951_v0 = vrot.slane %v950_v60, 2 }
 0x147   : > { %v942_v1 = vadd.f32 %v941_v61, %v940_v57  ;;  %v957_v2 = vrot.slane %v956_v62, 2 }
 0x148   : > { %v937_v3 = vrot.slane %v936_v63, 1  ;;  %v952_v4 = vadd.f32 %v951_v0, %v950_v60  ;;  %v1421_v60 = vld [vmem:[%s333_s20] ss:$0 sm:$0xff] }
 0x149   : > { %v943_v5 = vrot.slane %v942_v1, 1  ;;  %v958_v6 = vadd.f32 %v957_v2, %v956_v62 }
 0x14a   : > { %v938_v7 = vadd.f32 %v937_v3, %v936_v63  ;;  %v953_v8 = vrot.slane %v952_v4, 1 }
 0x14b   : > { %v944_v9 = vadd.f32 %v943_v5, %v942_v1  ;;  %v959_v10 = vrot.slane %v958_v6, 1 }
 0x14c   : > { %v945_v11 = vmul.f32 0.125, %v938_v7  ;;  %v954_v12 = vadd.f32 %v953_v8, %v952_v4 }
 0x14d   : > { %v960_v13 = vadd.f32 %v959_v10, %v958_v6  ;;  %v946_v14 = vmul.f32 0.125, %v944_v9 }
 0x14e   : > { %v961_v15 = vmul.f32 0.125, %v954_v12  ;;  %v963_v16 = vmul.f32 %v945_v11, %v945_v11 }
 0x14f   : > { %v962_v17 = vmul.f32 0.125, %v960_v13  ;;  %v964_v18 = vmul.f32 %v946_v14, %v946_v14 }
 0x150   : > { %v965_v19 = vsub.f32 %v961_v15, %v963_v16 }
 0x151   : > { %v966_v20 = vsub.f32 %v962_v17, %v964_v18 }
 0x152   : > { %v967_v21 = vmax.f32 %v965_v19, 0.0 }
 0x153   : > { %v968_v22 = vmax.f32 %v966_v20, 0.0 }
 0x154   : > { %v970_v23 = vadd.f32 1e-05, %v967_v21 }
 0x155   : > { %v971_v24 = vadd.f32 1e-05, %v968_v22 }
 0x156   : > { %1610 = vrsqrt.f32 %v970_v23 }
 0x157   : > { %1612 = vrsqrt.f32 %v971_v24 }
 0x160   : > { %v1611_v30 = vpop.eup %1610 }
 0x161   : > { %v1613_v32 = vpop.eup %1612 }
 0x162   : > { %v976_v33 = vcombine.low %v1611_v30, %v1613_v32 }
 0x164   : > { %v983_v34 = vrot.slane %v976_v33, %v982_v31 }
 0x166   : > { %v990_v36 = vrot.slane %v983_v34, %v982_v31 }
 0x168   : > { %v992_v39 = vmul.f32 %v990_v36, %v969_v35 }
 0x16a   : > { %v998_v40 = vrot.slane %v992_v39, %v997_v37  ;;  %v1002_v41 = vrot.slane %v992_v39, %v1001_v38 }
 0x16c   : > { %v1005_v42 = vmul.f32 %v998_v40, %v945_v11  ;;  %v1006_v43 = vmul.f32 %v1002_v41, %v946_v14  ;;  %v1027_v44 = vmul.f32 %v1767_v48, %v1002_v41  ;;  %v1026_v45 = vmul.f32 %v1765_v46, %v998_v40 }
 0x16e   : > { %v1009_v47 = vcombine.low %v1005_v42, %v1006_v43 }
 0x170   : > { %v1016_v49 = vrot.slane %v1009_v47, %v982_v31 }
 0x172   : > { %v1023_v51 = vrot.slane %v1016_v49, %v982_v31 }
 0x174   : > { %v1025_v52 = vsub.f32 %v993_v50, %v1023_v51 }
 0x176   : > { %v1036_v53 = vrot.slane %v1025_v52, %v1001_v38  ;;  %v1032_v54 = vrot.slane %v1025_v52, %v997_v37 }
 0x178   : > { %v1040_v55 = vadd.f32 %v1036_v53, %v1027_v44  ;;  %v1039_v56 = vadd.f32 %v1032_v54, %v1026_v45 }
 0x17a   : > { %v1042_v57 = vmax.f32 %v1040_v55, 0.0  ;;  %v1041_v58 = vmax.f32 %v1039_v56, 0.0 }
 0x17c   : > { %v1044_v48 = vpack.c.bf16 %v1042_v57, %v1042_v57  ;;  %v1043_v59 = vpack.c.bf16 %v1041_v58, %v1041_v58 }
 0x17e   : > { %1212 = vmatprep.mubr.bf16.mxu1 %v1044_v48 }
 0x17f   : > { %1213 = vmatmul.mubr.bf16.vlgmr.msra.gmra.mrb[4].mxu1 %v1043_v59 }
 0x252   : > { %v1457_v46 = vpop.f32.mrb[4].mxu1 }
 0x253   : > { %v1458_v61 = vpop.f32.mrb[5].mxu1 }
 0x254   : > { %v1459_v62 = vadd.f32 %v1458_v61, %v1457_v46  ;;  %v1460_v63 = vpop.f32.mrb[6].mxu1 }
 0x255   : > { %v1461_v0 = vpop.f32.mrb[7].mxu1 }
 0x256   : > { %v1215_v1 = vadd.f32 %v1459_v62, %v1421_v60 }
 0x258   : > { %1220 = vst [vmem:[%s337_s26] sm:$0xff] %v1215_v1 }
 0x259 PF: > { %s16_s21 = sadd.s32 1, %s1620_s21  }
 0x25a   : > { %p13_p4 = scmp.ge.s32.totalorder %s16_s21, 4  }
 0x25c   :  { %15 = sbr.rel (!%p13_p4) target bundleno = 1 (0x1), region = 89 }

</bundles_post_ra>
